<compile_context>
chip_gen: v7x
topology: tpu7x:2x2x1
jax: 0.10.0
libtpu: 0.0.40
codegen_flags: <defaults>
</compile_context>

<pallas_src>
import jax
import jax.numpy as jnp
from jax.experimental import pallas as pl
from jax.experimental.pallas import tpu as pltpu


_VMEM_LIMIT = 48 * 1024 * 1024  # explicit scoped-VMEM cap (< v7x 64 MiB physical)


# ---------------------------------------------------------------------------
# Kernel A: linear1 -> bn1 -> relu, then the fused [identity | q | k | v]
#           projection; writes one lane-dense (tn, 4C) slab per tile.
# ---------------------------------------------------------------------------
def _proj_kernel(x_ref, w1_ref, aff1_ref, wslab_ref, bslab_ref, out_ref):
    x = x_ref[...]                                            # (tn, Cin) f32
    z = jnp.dot(x.astype(jnp.bfloat16), w1_ref[...],
                preferred_element_type=jnp.float32)           # linear1 (no bias)
    aff = aff1_ref[...]                                       # (2, C)
    y1 = jnp.maximum(z * aff[0] + aff[1], 0.0)                # bn1 + relu
    # [y1 | q | k | v] in one MXU pass: wslab = [I | Wq | Wk | Wv] (C, 4C).
    out_ref[...] = jnp.dot(y1.astype(jnp.bfloat16), wslab_ref[...],
                           preferred_element_type=jnp.float32) + bslab_ref[...]


# ---------------------------------------------------------------------------
# Kernel B: positional-encoding MLP (VPU), attention MLP, softmax over the
#           neighbor axis, weighted sum, and the block tail
#           (bn -> relu -> linear2 -> bn2 -> residual -> relu), fused per tile.
# ---------------------------------------------------------------------------
def _attn_kernel(slab_ref, g_ref, p_ref, pp_ref, wp2_ref, vec_ref,
                 wa1_ref, wa2_ref, w2_ref, out_ref):
    tn, K, _ = g_ref.shape
    C = slab_ref.shape[-1] // 4

    slab = slab_ref[...]                                      # (tn, 4C) f32
    y1 = slab[:, 0:C]
    q = slab[:, C:2 * C]

    g = g_ref[...]                                            # (tn, K, 2C+3) f32
    nk = g[..., 0:C]                                          # grouped keys
    nv = g[..., C:2 * C]                                      # grouped values
    gxyz = g[..., 2 * C:2 * C + 3]                            # neighbor xyz
    rel = gxyz - p_ref[...][:, None, :]                       # relative coords

    pp = pp_ref[...]                                          # (4, 3): folded conv+bn
    wp2 = wp2_ref[...]                                        # (3, C)
    vec = vec_ref[...]                                        # (10, C) packed vectors

    # to_pos_enc: conv(3->3, no bias)+bn folded into pp[0:3]/pp[3]; relu; conv(3->C).
    # Done entirely on the VPU with lane broadcasts (no MXU push, no reshape).
    r = (rel[..., 0:1] * pp[0] + rel[..., 1:2] * pp[1]
         + rel[..., 2:3] * pp[2] + pp[3])
    r = jnp.maximum(r, 0.0)                                   # (tn, K, 3)
    n_r = (r[..., 0:1] * wp2[0] + r[..., 1:2] * wp2[1]
           + r[..., 2:3] * wp2[2] + vec[5])                   # (tn, K, C)  (+ bp2)

    n_v = nv + n_r

    # to_attn: bn -> relu -> conv(no bias) -> bn -> relu -> conv(+bias)
    t = q[:, None, :] - nk + n_r                              # (tn, K, C)
    t2 = t.reshape(tn * K, C)
    a = jnp.maximum(t2 * vec[0] + vec[1], 0.0)                # sa1, ta1
    a = jnp.dot(a.astype(jnp.bfloat16), wa1_ref[...],
                preferred_element_type=jnp.float32)
    a = jnp.maximum(a * vec[2] + vec[3], 0.0)                 # sa2, ta2
    a = jnp.dot(a.astype(jnp.bfloat16), wa2_ref[...],
                preferred_element_type=jnp.float32) + vec[4]  # + ba2
    a = a.reshape(tn, K, C)

    # softmax over the neighbor axis (PyTorch dim=-1 on (B, C, N, K))
    m = jnp.max(a, axis=1, keepdims=True)
    e = jnp.exp(a - m)
    a = e * pl.reciprocal(jnp.sum(e, axis=1, keepdims=True), approx=True)

    y = jnp.sum(n_v * a, axis=1)                              # (tn, C)

    # block tail: bn -> relu -> linear2 -> bn2 -> + y1 -> relu
    y = jnp.maximum(y * vec[6] + vec[7], 0.0)
    y = jnp.dot(y.astype(jnp.bfloat16), w2_ref[...],
                preferred_element_type=jnp.float32)
    y = y * vec[8] + vec[9]
    out_ref[...] = jnp.maximum(y + y1, 0.0).reshape(out_ref.shape)


# ---------------------------------------------------------------------------
# Wrappers / glue
# ---------------------------------------------------------------------------
def _round_up(x, m):
    return ((x + m - 1) // m) * m


def _pick_tile(n, k, tn_max=128, vmem_budget=16 << 20):
    """Largest point tile (multiple of 8) whose kernel-B working set fits a
    conservative VMEM budget (sized for v7x's 32 MiB scoped default)."""
    # per point: double-buffered gathered-neighbor block + ~8 live lane-padded
    # (K, C<=128) f32 intermediates.
    per_point = 4 * 128 * k * (2 + 8)
    tn = min(tn_max, _round_up(n, 8))
    tn = _round_up(tn, 8)
    while tn > 8 and tn * per_point > vmem_budget:
        tn = _round_up(tn // 2, 8)
    return max(tn, 8)


def _full_spec(arr):
    n = arr.ndim
    return pl.BlockSpec(arr.shape, lambda b, i, _n=n: (0,) * _n)


def _run_proj(x, pk, tn):
    B, Np, Cin = x.shape
    C = pk["aff1"].shape[1]
    grid = (B, Np // tn)
    x_spec = pl.BlockSpec((pl.Squeezed(), tn, Cin), lambda b, i: (b, i, 0))
    out_spec = pl.BlockSpec((pl.Squeezed(), tn, 4 * C), lambda b, i: (b, i, 0))
    weights = [pk["w1"], pk["aff1"], pk["wslab"], pk["bslab"]]
    in_specs = [x_spec] + [_full_spec(a) for a in weights]
    return pl.pallas_call(
        _proj_kernel,
        out_shape=jax.ShapeDtypeStruct((B, Np, 4 * C), jnp.float32),
        grid_spec=pltpu.PrefetchScalarGridSpec(
            num_scalar_prefetch=0, grid=grid,
            in_specs=in_specs, out_specs=out_spec),
        compiler_params=pltpu.CompilerParams(
            dimension_semantics=("parallel", "parallel"),
            vmem_limit_bytes=_VMEM_LIMIT),
    )(x, *weights)


def _run_attn(slab, g, p_pad, pk, tn):
    B, Np, C4 = slab.shape
    C = C4 // 4
    K = g.shape[2]
    W = g.shape[3]
    grid = (B, Np // tn)
    slab_spec = pl.BlockSpec((pl.Squeezed(), tn, C4), lambda b, i: (b, i, 0))
    g_spec = pl.BlockSpec((pl.Squeezed(), tn, K, W), lambda b, i: (b, i, 0, 0))
    p_spec = pl.BlockSpec((pl.Squeezed(), tn, 3), lambda b, i: (b, i, 0))

    # Lane-dense output layout when the tile allows it (pure layout plumbing).
    lane_dense = (tn * C) % (128 * 8) == 0
    if lane_dense:
        rows = tn * C // 128
        out_shape = jax.ShapeDtypeStruct((B, Np * C // 128, 128), jnp.float32)
        out_spec = pl.BlockSpec((pl.Squeezed(), rows, 128), lambda b, i: (b, i, 0))
    else:
        out_shape = jax.ShapeDtypeStruct((B, Np, C), jnp.float32)
        out_spec = pl.BlockSpec((pl.Squeezed(), tn, C), lambda b, i: (b, i, 0))

    weights = [pk["pp"], pk["wp2"], pk["vecs"], pk["wa1"], pk["wa2"], pk["w2"]]
    in_specs = [slab_spec, g_spec, p_spec] + [_full_spec(a) for a in weights]
    y = pl.pallas_call(
        _attn_kernel,
        out_shape=out_shape,
        grid_spec=pltpu.PrefetchScalarGridSpec(
            num_scalar_prefetch=0, grid=grid,
            in_specs=in_specs, out_specs=out_spec),
        compiler_params=pltpu.CompilerParams(
            dimension_semantics=("parallel", "parallel"),
            vmem_limit_bytes=_VMEM_LIMIT),
    )(slab, g, p_pad, *weights)
    return y.reshape(B, Np, C)


def point_transformer_block(p, x, params, *, num_neighbors=16, tn=128):
    """p: (B, N, 3) xyz;  x: (B, N, Cin) features (channel-last)."""
    B, N, _ = x.shape
    C = params["w1"].shape[1]
    K = num_neighbors
    pk = _pack_params(params)

    tn = _pick_tile(N, K, tn_max=tn)
    Np = _round_up(N, tn)

    # Kernel A on the (padded) point set -> [y1 | q | k | v] slab.
    x_pad = jnp.pad(x, ((0, 0), (0, Np - N), (0, 0)))
    slab = _run_proj(x_pad, pk, tn)                           # (B, Np, 4C)

    # pointops.QueryAndGroup equivalent (plain JAX): kNN on the real points,
    # then ONE gather of the packed per-neighbor payload [k | v | xyz].
    d2 = jnp.sum((p[:, :, None, :] - p[:, None, :, :]) ** 2, axis=-1)
    _, idx = jax.lax.top_k(-d2, K)                            # (B, N, K), incl. self
    src = jnp.concatenate([slab[:, :N, 2 * C:4 * C], p], axis=-1)  # (B, N, 2C+3)
    bidx = jnp.arange(B)[:, None, None]
    g = src[bidx, idx]                                        # (B, N, K, 2C+3)
    g = jnp.pad(g, ((0, 0), (0, Np - N), (0, 0), (0, 0)))
    p_pad = jnp.pad(p, ((0, 0), (0, Np - N), (0, 0)))

    y = _run_attn(slab, g, p_pad, pk, tn)                     # (B, Np, C)
    return [p, y[:, :N]]


# ---------------------------------------------------------------------------
# Parameter packing (fused / kernel-friendly layouts)
# ---------------------------------------------------------------------------
def _pack_params(p):
    f32, bf16 = jnp.float32, jnp.bfloat16
    C = p["w1"].shape[1]
    pk = {}
    # kernel A
    pk["w1"] = p["w1"].astype(bf16)
    pk["aff1"] = jnp.concatenate([p["s1"], p["t1"]], axis=0).astype(f32)      # (2, C)
    eye = jnp.eye(C, dtype=f32)
    pk["wslab"] = jnp.concatenate(
        [eye, p["wq"], p["wk"], p["wv"]], axis=1).astype(bf16)                # (C, 4C)
    pk["bslab"] = jnp.concatenate(
        [jnp.zeros((1, C), f32), p["bq"], p["bk"], p["bv"]], axis=1).astype(f32)
    # kernel B: pos-enc conv1+bn folded into a single affine (rows 0..2 = A, row 3 = c)
    A = p["wp1"] * p["sp"]                                                    # (3, 3)
    pk["pp"] = jnp.concatenate([A, p["tp"]], axis=0).astype(f32)              # (4, 3)
    pk["wp2"] = p["wp2"].astype(f32)                                          # (3, C)
    pk["vecs"] = jnp.concatenate(
        [p["sa1"], p["ta1"], p["sa2"], p["ta2"], p["ba2"], p["bp2"],
         p["sbn"], p["tbn"], p["s2"], p["t2"]], axis=0).astype(f32)           # (10, C)
    pk["wa1"] = p["wa1"].astype(bf16)
    pk["wa2"] = p["wa2"].astype(bf16)
    pk["w2"] = p["w2"].astype(bf16)
    return pk


# ---------------------------------------------------------------------------
# Deterministic parameter initialization (synthetic; no checkpoint load)
# ---------------------------------------------------------------------------
def _init_params(key, in_channels, out_channels):
    C = out_channels
    keys = iter(jax.random.split(key, 32))

    def w(shape, scale=0.1):
        return (scale * jax.random.normal(next(keys), shape)).astype(jnp.float32)

    def bn(c, eps=1e-5):
        kg, kb, km, kv = jax.random.split(next(keys), 4)
        gamma = 1.0 + 0.1 * jax.random.normal(kg, (c,))
        beta = 0.1 * jax.random.normal(kb, (c,))
        mean = 0.1 * jax.random.normal(km, (c,))
        var = 1.0 + 0.1 * jax.random.uniform(kv, (c,))
        scale = gamma / jnp.sqrt(var + eps)
        shift = beta - mean * scale
        return (scale.reshape(1, c).astype(jnp.float32),
                shift.reshape(1, c).astype(jnp.float32))

    params = {}
    params["w1"] = w((in_channels, C))                  # linear1 (no bias)
    params["s1"], params["t1"] = bn(C)                  # bn1
    params["wq"], params["bq"] = w((C, C)), w((1, C))   # to_query
    params["wk"], params["bk"] = w((C, C)), w((1, C))   # to_key
    params["wv"], params["bv"] = w((C, C)), w((1, C))   # to_value
    params["wp1"] = w((3, 3))                           # to_pos_enc conv1 (no bias)
    params["sp"], params["tp"] = bn(3)                  # to_pos_enc bn
    params["wp2"], params["bp2"] = w((3, C)), w((1, C)) # to_pos_enc conv2
    params["sa1"], params["ta1"] = bn(C)                # to_attn bn1
    params["wa1"] = w((C, C))                           # to_attn conv1 (no bias)
    params["sa2"], params["ta2"] = bn(C)                # to_attn bn2
    params["wa2"], params["ba2"] = w((C, C)), w((1, C)) # to_attn conv2
    params["sbn"], params["tbn"] = bn(C)                # block bn
    params["w2"] = w((C, C))                            # linear2 (no bias)
    params["s2"], params["t2"] = bn(C)                  # bn2
    return params


if __name__ == "__main__":
    B, N, Cin, K = 2, 256, 32, 16
    key = jax.random.PRNGKey(0)
    kp, kx, kw = jax.random.split(key, 3)
    p = jax.random.normal(kp, (B, N, 3), jnp.float32)
    x = jax.random.normal(kx, (B, N, Cin), jnp.float32)
    params = _init_params(kw, Cin, Cin)

    p_out, y = point_transformer_block(p, x, params, num_neighbors=K, tn=128)
    jax.block_until_ready(y)
    assert p_out.shape == (B, N, 3)
    assert y.shape == (B, N, Cin) and y.dtype == jnp.float32
    assert bool(jnp.all(jnp.isfinite(y)))
    print("KERNEL_OK")
</pallas_src>

<mosaic_0001>
module attributes {stable_mosaic.version = 11 : i64} {
  func.func @_proj_kernel(%arg0: i32, %arg1: i32, %arg2: memref<1x128x32xf32, #tpu.memory_space<vmem>>, %arg3: memref<32x32xbf16, #tpu.memory_space<vmem>>, %arg4: memref<2x32xf32, #tpu.memory_space<vmem>>, %arg5: memref<32x128xbf16, #tpu.memory_space<vmem>>, %arg6: memref<1x128xf32, #tpu.memory_space<vmem>>, %arg7: memref<1x128x128xf32, #tpu.memory_space<vmem>>) attributes {dimension_semantics = [#tpu.dimension_semantics<parallel>, #tpu.dimension_semantics<parallel>], iteration_bounds = array<i64: 2, 2>, scalar_prefetch = 0 : i64, scratch_operands = 0 : i64, tpu.core_type = #tpu.core_type<tc>, window_params = [{transform_indices = @transform_0, window_bounds = array<i64: 1, 128, 32>}, {pipeline_mode = #tpu.pipeline_mode<synchronous>, transform_indices = @transform_1, window_bounds = array<i64: 32, 32>}, {pipeline_mode = #tpu.pipeline_mode<synchronous>, transform_indices = @transform_2, window_bounds = array<i64: 2, 32>}, {pipeline_mode = #tpu.pipeline_mode<synchronous>, transform_indices = @transform_3, window_bounds = array<i64: 32, 128>}, {pipeline_mode = #tpu.pipeline_mode<synchronous>, transform_indices = @transform_4, window_bounds = array<i64: 1, 128>}, {transform_indices = @transform_5, window_bounds = array<i64: 1, 128, 128>}]} {
    %c0 = arith.constant 0 : index
    %c0_0 = arith.constant 0 : index
    %c0_1 = arith.constant 0 : index
    %0 = vector.load %arg2[%c0, %c0_0, %c0_1] : memref<1x128x32xf32, #tpu.memory_space<vmem>>, vector<1x128x32xf32>
    %1 = vector.shape_cast %0 : vector<1x128x32xf32> to vector<128x32xf32>
    %2 = arith.truncf %1 : vector<128x32xf32> to vector<128x32xbf16>
    %c0_2 = arith.constant 0 : index
    %c0_3 = arith.constant 0 : index
    %3 = vector.load %arg3[%c0_2, %c0_3] : memref<32x32xbf16, #tpu.memory_space<vmem>>, vector<32x32xbf16>
    %cst = arith.constant dense<0.000000e+00> : vector<128x32xf32>
    %4 = tpu.matmul %2, %3, %cst {dimension_numbers = #tpu.dot_dimension_numbers<[1], [0], [0], [1], [0, 0, 1, 1], [], []>} : vector<128x32xbf16>, vector<32x32xbf16>, vector<128x32xf32> -> vector<128x32xf32>
    %c0_4 = arith.constant 0 : index
    %c0_5 = arith.constant 0 : index
    %5 = vector.load %arg4[%c0_4, %c0_5] : memref<2x32xf32, #tpu.memory_space<vmem>>, vector<2x32xf32>
    %6 = vector.extract_strided_slice %5 {offsets = [0, 0], sizes = [1, 32], strides = [1, 1]} : vector<2x32xf32> to vector<1x32xf32>
    %7 = vector.shape_cast %6 : vector<1x32xf32> to vector<32xf32>
    %8 = vector.shape_cast %7 : vector<32xf32> to vector<1x32xf32>
    %9 = vector.broadcast %8 : vector<1x32xf32> to vector<128x32xf32>
    %10 = arith.mulf %4, %9 : vector<128x32xf32>
    %11 = vector.extract_strided_slice %5 {offsets = [1, 0], sizes = [1, 32], strides = [1, 1]} : vector<2x32xf32> to vector<1x32xf32>
    %12 = vector.shape_cast %11 : vector<1x32xf32> to vector<32xf32>
    %13 = vector.shape_cast %12 : vector<32xf32> to vector<1x32xf32>
    %14 = vector.broadcast %13 : vector<1x32xf32> to vector<128x32xf32>
    %15 = arith.addf %10, %14 : vector<128x32xf32>
    %cst_6 = arith.constant 0.000000e+00 : f32
    %16 = vector.broadcast %cst_6 : f32 to vector<128x32xf32>
    %17 = arith.maximumf %15, %16 : vector<128x32xf32>
    %18 = arith.truncf %17 : vector<128x32xf32> to vector<128x32xbf16>
    %c0_7 = arith.constant 0 : index
    %c0_8 = arith.constant 0 : index
    %19 = vector.load %arg5[%c0_7, %c0_8] : memref<32x128xbf16, #tpu.memory_space<vmem>>, vector<32x128xbf16>
    %cst_9 = arith.constant dense<0.000000e+00> : vector<128x128xf32>
    %20 = tpu.matmul %18, %19, %cst_9 {dimension_numbers = #tpu.dot_dimension_numbers<[1], [0], [0], [1], [0, 0, 1, 1], [], []>} : vector<128x32xbf16>, vector<32x128xbf16>, vector<128x128xf32> -> vector<128x128xf32>
    %c0_10 = arith.constant 0 : index
    %c0_11 = arith.constant 0 : index
    %21 = vector.load %arg6[%c0_10, %c0_11] : memref<1x128xf32, #tpu.memory_space<vmem>>, vector<1x128xf32>
    %22 = vector.broadcast %21 : vector<1x128xf32> to vector<128x128xf32>
    %23 = arith.addf %20, %22 : vector<128x128xf32>
    %c0_12 = arith.constant 0 : index
    %c0_13 = arith.constant 0 : index
    %c0_14 = arith.constant 0 : index
    %24 = vector.load %arg7[%c0_12, %c0_13, %c0_14] : memref<1x128x128xf32, #tpu.memory_space<vmem>>, vector<1x128x128xf32>
    %25 = vector.shape_cast %24 : vector<1x128x128xf32> to vector<128x128xf32>
    %26 = vector.shape_cast %23 : vector<128x128xf32> to vector<1x128x128xf32>
    tpu.vector_store %arg7[%c0_12, %c0_13, %c0_14], %26 {strides = array<i32>} : memref<1x128x128xf32, #tpu.memory_space<vmem>>, vector<1x128x128xf32>,
    return
  }
  func.func @transform_0(%arg0: i32, %arg1: i32) -> (i32, i32, i32) {
    %c0_i32 = arith.constant 0 : i32
    %c0_i32_0 = arith.constant 0 : i32
    return %arg0, %arg1, %c0_i32 : i32, i32, i32
  }
  func.func @transform_1(%arg0: i32, %arg1: i32) -> (i32, i32) {
    %c0_i32 = arith.constant 0 : i32
    %c0_i32_0 = arith.constant 0 : i32
    %c0_i32_1 = arith.constant 0 : i32
    return %c0_i32, %c0_i32_0 : i32, i32
  }
  func.func @transform_2(%arg0: i32, %arg1: i32) -> (i32, i32) {
    %c0_i32 = arith.constant 0 : i32
    %c0_i32_0 = arith.constant 0 : i32
    %c0_i32_1 = arith.constant 0 : i32
    return %c0_i32, %c0_i32_0 : i32, i32
  }
  func.func @transform_3(%arg0: i32, %arg1: i32) -> (i32, i32) {
    %c0_i32 = arith.constant 0 : i32
    %c0_i32_0 = arith.constant 0 : i32
    %c0_i32_1 = arith.constant 0 : i32
    return %c0_i32, %c0_i32_0 : i32, i32
  }
  func.func @transform_4(%arg0: i32, %arg1: i32) -> (i32, i32) {
    %c0_i32 = arith.constant 0 : i32
    %c0_i32_0 = arith.constant 0 : i32
    %c0_i32_1 = arith.constant 0 : i32
    return %c0_i32, %c0_i32_0 : i32, i32
  }
  func.func @transform_5(%arg0: i32, %arg1: i32) -> (i32, i32, i32) {
    %c0_i32 = arith.constant 0 : i32
    %c0_i32_0 = arith.constant 0 : i32
    return %arg0, %arg1, %c0_i32 : i32, i32, i32
  }
}

</mosaic_0001>

<bundles_post_ra>
// kernel: tpu_custom_call.1
= control target key start
LH: loop header
LB: loop body
LE: loop exit
PB: predicated region body
PF: predicated region fallthrough
CT: control target
= control target key end

     0   :  { %10 = vsyncpa [#allocation3], 0  ;;  %s1296_s0 = inlined_call_operand.vmem [shape: f32[2,256,32], index: 0, kind: input, shape index: {}]   ;;  %s1297_s1 = inlined_call_operand.vmem [shape: bf16[32,32], index: 1, kind: input, shape index: {}]   ;;  %s1298_s2 = inlined_call_operand.vmem [shape: f32[2,32], index: 2, kind: input, shape index: {}]   ;;  %s1299_s3 = inlined_call_operand.vmem [shape: bf16[32,128], index: 3, kind: input, shape index: {}]   ;;  %s1300_s4 = inlined_call_operand.vmem [shape: f32[1,128], index: 4, kind: input, shape index: {}]   ;;  %s1301_s5 = inlined_call_operand.hbm [shape: f32[2,256,128], index: 5, kind: output, shape index: {}]  }
   0x1   :  { %12 = vsyncpa [#allocation3 + $0x1], 0  ;;  %s1042_s18 = smov 0   ;;  %s1044_s19 = smov 0  }
   0x2   :  { %s1046_s20 = smov 0   ;;  %s1048_s21 = smov 0  }
   0x3   :  { %s1050_s22 = smov 0   ;;  %s1052_s23 = smov 0  }
   0x4   :  { %s1054_s24 = smov 0   ;;  %s1056_s25 = smov 0  }
   0x5 LB: > { %s740_s26 = sadd.s32 4294967295, %s1007_s25   ;;  %s741_s27 = sadd.s32 4294967294, %s1007_s25   ;;  %s1007_s25 = sphi %s1056_s25, %s18_s25   ;;  %s1003_s24 = sphi %s1054_s24, %s1310_s24   ;;  %s999_s23 = sphi %s1052_s23, %s1309_s23   ;;  %s995_s22 = sphi %s1050_s22, %s1308_s22   ;;  %s991_s21 = sphi %s1048_s21, %s1307_s21   ;;  %s987_s20 = sphi %s1046_s20, %s1306_s20   ;;  %s983_s19 = sphi %s1044_s19, %s1305_s19   ;;  %s979_s18 = sphi %s1042_s18, %s1304_s18  }
   0x6   : > { %s27_s28 = sadd.s32 1, %s999_s23  ;;  %s30_s29 = sadd.s32 1, %s1003_s24 }
   0x7   : > { %p28_p0 = scmp.ge.s32.totalorder %s27_s28, 2  ;;  %p161_p1 = scmp.ne.s32.totalorder %s987_s20, %s983_s19 }
   0x8   : > { %p162_p2 = scmp.eq.s32.totalorder %s740_s26, 3  ;;  %p167_p5 = scmp.ne.s32.totalorder %s983_s19, %s979_s18 }
   0x9   : > { %s1312_s28 = smov (%p28_p0, %s27_s28), 0  ;;  %s1314_s29 = smov (!%p28_p0, %s30_s29), %s1003_s24 }
   0xa   : > { %s147_s30 = ssub.s32 %s999_s23, %s1312_s28  ;;  %p1093_p3 = por %p162_p2, %p161_p1 }
   0xb   : > { %p32_p4 = scmp.ge.s32.totalorder %s1314_s29, 2  ;;  %p168_p6 = scmp.eq.s32.totalorder %s741_s27, 3 }
   0xc   : > { %p744_p7 = scmp.ge.s32.totalorder %s1007_s25, 1  ;;  %p211_p9 = scmp.lt.s32.totalorder %s1007_s25, 5 }
   0xd   : > { %s1316_s29 = smov (%p32_p4, %s1314_s29), 0  ;;  %p1102_p8 = por %p168_p6, %p167_p5 }
   0xe   : > { %s146_s8 = ssub.s32 %s1003_s24, %s1316_s29  ;;  %s151_s9 = sadd.s32 1, %s987_s20 }
   0xf   : > { %s148_s10 = sor.u32 %s147_s30, %s146_s8  ;;  %p212_p10 = pnand %p744_p7, %p211_p9 }
  0x10   : > { %p149_p11 = scmp.eq.s32.totalorder %s148_s10, 0  ;;  %v909_v0 = vld [vmem:[%s1297_s1] sm:$0xff] (!%p212_p10)   ;;  %s1117_s14 = sshll.u32 (!%p212_p10), %s991_s21, 4  ;;  %v910_v1 = vld [vmem:[%s1297_s1 + $0x8] sm:$0xff] (!%p212_p10)   ;;  %vm295_vm0 = vcmask (!%p212_p10), 261120   ;;  %v418_v28 = vlaneseq (!%p212_p10) }
  0x11   : > { %215 = sbr.rel (%p212_p10) target bundleno = 514 (0x202), region = 40  ;;  %p244_p12 = scmp.lt.s32.totalorder (!%p212_p10), %s995_s22, 1  ;;  %796 = vmatprep.subr.bf16.mxu0 (!%p212_p10), %v909_v0  ;;  %v911_v26 = vld [vmem:[%s1299_s3] sm:$0xff] (!%p212_p10)   ;;  %v912_v27 = vld [vmem:[%s1299_s3 + $0x8] sm:$0xff] (!%p212_p10)  }
  0x12   : > { %s1111_s11 = scalar_select %p149_p11, %s987_s20, %s151_s9  }
  0x13   : > { %p246_p13 = scmp.lt.s32.totalorder (!%p212_p10), %s1117_s14, 31  ;;  %797 = vmatpush3.bf16.msra.mxu0 (!%p212_p10), %v909_v0  ;;  %816 = vmatprep.subr.bf16.mxu1 (!%p212_p10), %v911_v26  ;;  %v419_v29 = vshrl.u32 (!%p212_p10), %v418_v28, 7  ;;  %v417_v31 = vld [vmem:[%s1298_s2] sm:$0x3] (!%p212_p10) }
  0x14   : > { %798 = vmatprep.subr.bf16.mxu0 (!%p212_p10), %v910_v1  ;;  %817 = vmatpush3.bf16.msra.mxu1 (!%p212_p10), %v911_v26 }
  0x15   : > { %818 = vmatprep.subr.bf16.mxu1 (!%p212_p10), %v912_v27  ;;  %v420_v30 = vsub.s32 (!%p212_p10), 0, %v419_v29  ;;  %v440_v32 = vsub.s32 (!%p212_p10), 1, %v419_v29 }
  0x17   : > { %799 = vmatpush3.bf16.msra.mxu0 (!%p212_p10), %v910_v1  ;;  %v1164_v33 = vrot.slane (!%p212_p10), %v417_v31, %v420_v30  ;;  %v1166_v34 = vrot.slane (!%p212_p10), %v417_v31, %v440_v32 }
  0x18   : > { %s245_s17 = scalar_select %p244_p12, %s995_s22, 1  ;;  %819 = vmatpush3.bf16.msra.mxu1 %v912_v27 }
  0x19   : > { %s247_s26 = scalar_select %p246_p13, %s1117_s14, 31 }
  0x1a   : > { %s747_s27 = sshll.u32 %s245_s17, 5 }
  0x1b   : > { %s249_s30 = sadd.s32 %s747_s27, %s247_s26  ;;  %s240_s27 = sand.u32 1, %s983_s19  }
  0x1c   : > { %s748_s8 = sshll.u32 %s249_s30, 3  ;;  %s745_s30 = sshll.u32 %s240_s27, 7 }
  0x1d   : > { %s1129_s10 = scalar_lea.vmem %s1296_s0, %s748_s8  ;;  %s1214_s21 = scalar_lea.vmem [#allocation2], %s745_s30 }
  0x1e   : > { %v255_v2 = vld [vmem:[%s1129_s10] sm:$0xff]  ;;  %v256_v3 = vld [vmem:[%s1129_s10 + $0x8] sm:$0xff]  ;;  %v257_v4 = vld [vmem:[%s1129_s10 + $0x10] sm:$0xff]  ;;  %s1009_s30 = smov [#allocation2]  }
  0x1f   : > { %v271_v5 = vpack.c.bf16 %v256_v3, %v255_v2  ;;  %v258_v6 = vld [vmem:[%s1129_s10 + $0x18] sm:$0xff]  ;;  %v259_v7 = vld [vmem:[%s1129_s10 + $0x20] sm:$0xff]  ;;  %v260_v8 = vld [vmem:[%s1129_s10 + $0x28] sm:$0xff]  ;;  %s917_s8 = sshll.u32 %s1009_s30, 4  ;;  %s918_s8 = int_to_ptr.vmem [resolvable:$false] %s917_s8 }
  0x20   : > { %v272_v9 = vpack.c.bf16 %v258_v6, %v257_v4  ;;  %v273_v10 = vpack.c.bf16 %v260_v8, %v259_v7  ;;  %v261_v11 = vld [vmem:[%s1129_s10 + $0x30] sm:$0xff]  ;;  %v262_v12 = vld [vmem:[%s1129_s10 + $0x38] sm:$0xff]  ;;  %v263_v13 = vld [vmem:[%s1129_s10 + $0x40] sm:$0xff]  ;;  %s919_s9 = scalar_lea.vmem %s918_s8, 4096 }
  0x21   : > { %800 = vmatprep.mubr.msk.bf16.mxu0 %vm295_vm0, %v271_v5  ;;  %v264_v14 = vld [vmem:[%s1129_s10 + $0x48] sm:$0xff]  ;;  %v274_v15 = vpack.c.bf16 %v262_v12, %v261_v11  ;;  %v265_v17 = vld [vmem:[%s1129_s10 + $0x50] sm:$0xff]  ;;  %v266_v18 = vld [vmem:[%s1129_s10 + $0x58] sm:$0xff] }
  0x22   : > { %801 = vmatmul.mubr.msk.bf16.vlgmr.msra.gmra.mrb[0].mxu0 %vm295_vm0, %v272_v9  ;;  %v275_v16 = vpack.c.bf16 %v264_v14, %v263_v13  ;;  %v267_v19 = vld [vmem:[%s1129_s10 + $0x60] sm:$0xff]  ;;  %v268_v20 = vld [vmem:[%s1129_s10 + $0x68] sm:$0xff]  ;;  %v276_v21 = vpack.c.bf16 %v266_v18, %v265_v17  ;;  %v269_v23 = vld [vmem:[%s1129_s10 + $0x70] sm:$0xff] }
  0x23   : > { %804 = vmatprep.mubr.msk.bf16.mxu0 %vm295_vm0, %v273_v10  ;;  %v277_v22 = vpack.c.bf16 %v268_v20, %v267_v19  ;;  %v270_v24 = vld [vmem:[%s1129_s10 + $0x78] sm:$0xff]  ;;  %s772_s10 = sshll.u32 %s995_s22, 5  ;;  %s658_s22 = sshll.u32 %s1214_s21, 4  ;;  %s1237_s22 = int_to_ptr.vmem [resolvable:$true] %s658_s22 }
  0x24   : > { %v278_v25 = vpack.c.bf16 %v270_v24, %v269_v23  ;;  %s655_s12 = sadd.s32 %s772_s10, %s1117_s14  ;;  %s1244_s14 = scalar_lea.sflag [#allocation3], %s240_s27 }
  0x25   : > { %s773_s13 = sshll.u32 %s655_s12, 7  ;;  %s913_s26 = scalar_lea.vmem %s1237_s22, 2048 }
  0x26   : > { %s1234_s17 = scalar_lea.hbm %s1301_s5, %s773_s13  ;;  %p914_p0 = scmp.ne.s32.totalorder %s1237_s22, %s913_s26 }
  0x27   : > { %p920_p4 = scmp.lt.s32.totalorder %s1237_s22, %s918_s8  ;;  %p921_p5 = scmp.lt.s32.totalorder %s919_s9, %s913_s26 }
  0x28   : > { %p915_p1 = pnand %p914_p0, %p1093_p3 }
  0x29   : > { %p922_p6 = por %p921_p5, %p920_p4 }
  0x2a   : > { %805 = vmatmul.mubr.msk.bf16.gmra.mrb[4].mxu0 %vm295_vm0, %v274_v15  ;;  %p916_p2 = pneg %p915_p1 }
  0x2b   : > { %808 = vmatprep.mubr.msk.bf16.mxu0 %vm295_vm0, %v275_v16 }
  0x2c   : > { %p923_p7 = pnand %p922_p6, %p916_p2 }
  0x32   : > { %809 = vmatmul.mubr.msk.bf16.gmra.mrb[8].mxu0 %vm295_vm0, %v276_v21 }
  0x33   : > { %812 = vmatprep.mubr.msk.bf16.mxu0 %vm295_vm0, %v277_v22 }
  0x3a   : > { %813 = vmatmul.mubr.msk.bf16.gmra.mrb[12].mxu0 %vm295_vm0, %v278_v25 }
  0xf5   : > { %v802_v35 = vpop.f32.mrb[0].mxu0 }
  0xf6   : > { %v424_v36 = vmul.f32 %v802_v35, %v1164_v33  ;;  %v354_v37 = vpop.f32.mrb[1].mxu0 }
  0xf7   : > { %v422_v38 = vmul.f32 %v1164_v33, %v354_v37  ;;  %v803_v39 = vpop.f32.mrb[2].mxu0 }
  0xf8   : > { %v444_v40 = vadd.f32 %v1166_v34, %v424_v36  ;;  %v425_v41 = vmul.f32 %v803_v39, %v1164_v33  ;;  %v357_v42 = vpop.f32.mrb[3].mxu0 }
  0xf9   : > { %v442_v43 = vadd.f32 %v1166_v34, %v422_v38  ;;  %v423_v44 = vmul.f32 %v1164_v33, %v357_v42 }
  0xfa   : > { %v445_v45 = vadd.f32 %v1166_v34, %v425_v41  ;;  %v460_v47 = vmax.f32 %v444_v40, 0.0 }
  0xfb   : > { %v443_v46 = vadd.f32 %v1166_v34, %v423_v44  ;;  %v458_v49 = vmax.f32 %v442_v43, 0.0 }
  0xfc   : > { %v461_v48 = vmax.f32 %v445_v45, 0.0 }
  0xfd   : > { %v459_v50 = vmax.f32 %v443_v46, 0.0  ;;  %v806_v51 = vpop.f32.mrb[4].mxu0 }
  0xfe   : > { %v475_v52 = vpack.c.bf16 %v461_v48, %v460_v47  ;;  %v428_v53 = vmul.f32 %v806_v51, %v1164_v33  ;;  %v370_v54 = vpop.f32.mrb[5].mxu0 }
  0xff   : > { %v426_v55 = vmul.f32 %v1164_v33, %v370_v54  ;;  %v807_v56 = vpop.f32.mrb[6].mxu0  ;;  %v474_v57 = vpack.c.bf16 %v459_v50, %v458_v49 }
 0x100   : > { %v448_v58 = vadd.f32 %v1166_v34, %v428_v53  ;;  %v429_v59 = vmul.f32 %v807_v56, %v1164_v33  ;;  %v373_v60 = vpop.f32.mrb[7].mxu0 }
 0x101   : > { %v446_v61 = vadd.f32 %v1166_v34, %v426_v55  ;;  %v427_v62 = vmul.f32 %v1164_v33, %v373_v60  ;;  %820 = vmatprep.mubr.msk.bf16.mxu1 %vm295_vm0, %v474_v57 }
 0x102   : > { %v449_v63 = vadd.f32 %v1166_v34, %v429_v59  ;;  %821 = vmatmul.mubr.msk.bf16.vlgmr.msra.gmra.mrb[0].mxu1 %vm295_vm0, %v475_v52  ;;  %v464_v1 = vmax.f32 %v448_v58, 0.0 }
 0x103   : > { %v447_v0 = vadd.f32 %v1166_v34, %v427_v62  ;;  %v462_v3 = vmax.f32 %v446_v61, 0.0 }
 0x104   : > { %v465_v2 = vmax.f32 %v449_v63, 0.0 }
 0x105   : > { %v463_v4 = vmax.f32 %v447_v0, 0.0  ;;  %v810_v5 = vpop.f32.mrb[8].mxu0 }
 0x106   : > { %v477_v6 = vpack.c.bf16 %v465_v2, %v464_v1  ;;  %v432_v7 = vmul.f32 %v810_v5, %v1164_v33  ;;  %v386_v8 = vpop.f32.mrb[9].mxu0 }
 0x107   : > { %v476_v9 = vpack.c.bf16 %v463_v4, %v462_v3  ;;  %v430_v10 = vmul.f32 %v1164_v33, %v386_v8  ;;  %v811_v11 = vpop.f32.mrb[10].mxu0 }
 0x108   : > { %v452_v12 = vadd.f32 %v1166_v34, %v432_v7  ;;  %v433_v13 = vmul.f32 %v811_v11, %v1164_v33  ;;  %v389_v14 = vpop.f32.mrb[11].mxu0 }
 0x109   : > { %v450_v15 = vadd.f32 %v1166_v34, %v430_v10  ;;  %v431_v16 = vmul.f32 %v1164_v33, %v389_v14  ;;  %824 = vmatprep.mubr.msk.bf16.mxu1 %vm295_vm0, %v476_v9 }
 0x10a   : > { %v453_v17 = vadd.f32 %v1166_v34, %v433_v13  ;;  %825 = vmatmul.mubr.msk.bf16.gmra.mrb[4].mxu1 %vm295_vm0, %v477_v6  ;;  %v468_v19 = vmax.f32 %v452_v12, 0.0 }
 0x10b   : > { %v451_v18 = vadd.f32 %v1166_v34, %v431_v16  ;;  %v466_v21 = vmax.f32 %v450_v15, 0.0 }
 0x10c   : > { %v469_v20 = vmax.f32 %v453_v17, 0.0 }
 0x10d   : > { %v467_v22 = vmax.f32 %v451_v18, 0.0  ;;  %v814_v23 = vpop.f32.mrb[12].mxu0 }
 0x10e   : > { %v479_v24 = vpack.c.bf16 %v469_v20, %v468_v19  ;;  %v436_v25 = vmul.f32 %v814_v23, %v1164_v33  ;;  %v402_v26 = vpop.f32.mrb[13].mxu0 }
 0x10f   : > { %v478_v27 = vpack.c.bf16 %v467_v22, %v466_v21  ;;  %v434_v28 = vmul.f32 %v1164_v33, %v402_v26  ;;  %v815_v29 = vpop.f32.mrb[14].mxu0 }
 0x110   : > { %v456_v30 = vadd.f32 %v1166_v34, %v436_v25  ;;  %v437_v31 = vmul.f32 %v815_v29, %v1164_v33  ;;  %v405_v32 = vpop.f32.mrb[15].mxu0 }
 0x111   : > { %v454_v35 = vadd.f32 %v1166_v34, %v434_v28  ;;  %v435_v36 = vmul.f32 %v1164_v33, %v405_v32  ;;  %828 = vmatprep.mubr.msk.bf16.mxu1 %vm295_vm0, %v478_v27  ;;  %v759_v33 = vld [vmem:[%s1300_s4] ss:$0 sm:$0xff] }
 0x112   : > { %v457_v37 = vadd.f32 %v1166_v34, %v437_v31  ;;  %829 = vmatmul.mubr.msk.bf16.gmra.mrb[8].mxu1 %vm295_vm0, %v479_v24  ;;  %v472_v39 = vmax.f32 %v456_v30, 0.0 }
 0x113   : > { %v455_v38 = vadd.f32 %v1166_v34, %v435_v36  ;;  %v470_v41 = vmax.f32 %v454_v35, 0.0 }
 0x114   : > { %v473_v40 = vmax.f32 %v457_v37, 0.0 }
 0x115   : > { %v471_v42 = vmax.f32 %v455_v38, 0.0 }
 0x116   : > { %v481_v43 = vpack.c.bf16 %v473_v40, %v472_v39 }
 0x117   : > { %v480_v44 = vpack.c.bf16 %v471_v42, %v470_v41 }
 0x119   : > { %832 = vmatprep.mubr.msk.bf16.mxu1 %vm295_vm0, %v480_v44 }
 0x11a   : > { %833 = vmatmul.mubr.msk.bf16.gmra.mrb[12].mxu1 %vm295_vm0, %v481_v43 }
 0x1d5   : > { %v822_v45 = vpop.f32.mrb[0].mxu1 }
 0x1d6   : > { %v572_v46 = vadd.f32 %v822_v45, %v759_v33  ;;  %v563_v34 = vpop.f32.mrb[1].mxu1 }
 0x1d7   : > { %v564_v47 = vadd.f32 %v759_v33, %v563_v34  ;;  %v823_v48 = vpop.f32.mrb[2].mxu1 }
 0x1d8   : > { %628 = vst [vmem:[%s1214_s21 + $0x10] sm:$0xff] %v572_v46  ;;  %v575_v49 = vadd.f32 %v823_v48, %v759_v33  ;;  %v566_v50 = vpop.f32.mrb[3].mxu1 }
 0x1d9   : > { %626 = vst [vmem:[%s1214_s21] sm:$0xff] %v564_v47  ;;  %v567_v51 = vadd.f32 %v759_v33, %v566_v50 }
 0x1da   : > { %629 = vst [vmem:[%s1214_s21 + $0x18] sm:$0xff] %v575_v49 }
 0x1db   : > { %627 = vst [vmem:[%s1214_s21 + $0x8] sm:$0xff] %v567_v51 }
 0x1dd   : > { %v826_v52 = vpop.f32.mrb[4].mxu1 }
 0x1de   : > { %v588_v53 = vadd.f32 %v826_v52, %v759_v33  ;;  %v579_v54 = vpop.f32.mrb[5].mxu1 }
 0x1df   : > { %v580_v55 = vadd.f32 %v759_v33, %v579_v54  ;;  %v827_v56 = vpop.f32.mrb[6].mxu1 }
 0x1e0   : > { %632 = vst [vmem:[%s1214_s21 + $0x30] sm:$0xff] %v588_v53  ;;  %v591_v57 = vadd.f32 %v827_v56, %v759_v33  ;;  %v582_v58 = vpop.f32.mrb[7].mxu1 }
 0x1e1   : > { %630 = vst [vmem:[%s1214_s21 + $0x20] sm:$0xff] %v580_v55  ;;  %v583_v59 = vadd.f32 %v759_v33, %v582_v58 }
 0x1e2   : > { %633 = vst [vmem:[%s1214_s21 + $0x38] sm:$0xff] %v591_v57 }
 0x1e3   : > { %631 = vst [vmem:[%s1214_s21 + $0x28] sm:$0xff] %v583_v59 }
 0x1e5   : > { %v830_v60 = vpop.f32.mrb[8].mxu1 }
 0x1e6   : > { %v604_v61 = vadd.f32 %v830_v60, %v759_v33  ;;  %v595_v62 = vpop.f32.mrb[9].mxu1 }
 0x1e7   : > { %v596_v63 = vadd.f32 %v759_v33, %v595_v62  ;;  %v831_v0 = vpop.f32.mrb[10].mxu1 }
 0x1e8   : > { %636 = vst [vmem:[%s1214_s21 + $0x50] sm:$0xff] %v604_v61  ;;  %v607_v1 = vadd.f32 %v831_v0, %v759_v33  ;;  %v598_v2 = vpop.f32.mrb[11].mxu1 }
 0x1e9   : > { %634 = vst [vmem:[%s1214_s21 + $0x40] sm:$0xff] %v596_v63  ;;  %v599_v3 = vadd.f32 %v759_v33, %v598_v2 }
 0x1ea   : > { %637 = vst [vmem:[%s1214_s21 + $0x58] sm:$0xff] %v607_v1 }
 0x1eb   : > { %635 = vst [vmem:[%s1214_s21 + $0x48] sm:$0xff] %v599_v3 }
 0x1ed   : > { %v834_v4 = vpop.f32.mrb[12].mxu1 }
 0x1ee   : > { %v620_v5 = vadd.f32 %v834_v4, %v759_v33  ;;  %v611_v6 = vpop.f32.mrb[13].mxu1 }
 0x1ef   : > { %v612_v7 = vadd.f32 %v759_v33, %v611_v6  ;;  %v835_v8 = vpop.f32.mrb[14].mxu1 }
 0x1f0   : > { %640 = vst [vmem:[%s1214_s21 + $0x70] sm:$0xff] %v620_v5  ;;  %v623_v9 = vadd.f32 %v835_v8, %v759_v33  ;;  %v614_v10 = vpop.f32.mrb[15].mxu1 }
 0x1f1   : > { %638 = vst [vmem:[%s1214_s21 + $0x60] sm:$0xff] %v612_v7  ;;  %v615_v11 = vadd.f32 %v759_v33, %v614_v10 }
 0x1f2   : > { %641 = vst [vmem:[%s1214_s21 + $0x78] sm:$0xff] %v623_v9 }
 0x1f3   : > { %639 = vst [vmem:[%s1214_s21 + $0x68] sm:$0xff] %v615_v11 }
 0x1f4   : > { %926 = shalt.err (!%p923_p7)
}
 0x1f5   : > { %s927_s27 = scalar_lea.hbm %s1234_s17, 2048  ;;  %s931_s12 = scalar_lea.hbm %s1301_s5, 8192 }
 0x1f6   : > { %p928_p9 = scmp.ne.s32.totalorder %s1234_s17, %s927_s27  ;;  %p932_p12 = scmp.lt.u32.totalorder %s1234_s17, %s1301_s5 }
 0x1f7   : > { %p933_p13 = scmp.lt.u32.totalorder %s931_s12, %s927_s27  ;;  %p935_p1 = scmp.lt.u32.totalorder %s927_s27, %s1234_s17 }
 0x1f8   : > { %p929_p10 = pnand %p928_p9, %p1093_p3 }
 0x1f9   : > { %p934_p0 = por %p933_p13, %p932_p12 }
 0x1fa   : > { %p930_p11 = pneg %p929_p10 }
 0x1fb   : > { %p936_p2 = por %p935_p1, %p934_p0 }
 0x1fd   : > { %p937_p4 = pnand %p936_p2, %p930_p11 }
 0x1ff   : > { %940 = shalt.err (!%p937_p4)
}
 0x200   : > { %s1010_s16 = smov 128   ;;  %s1011_s26 = smov 8  }
 0x201   : > { %836 = dma.vmem_to_hbm [thread:$0]  (%p1093_p3), %s1237_s22, 2048, %s1234_s17, %s1244_s14, %s1010_s16, %s1010_s16, %s1011_s26  }
 0x202 PF: > { %p842_p5 = scmp.ge.s32.totalorder %s1007_s25, 2  ;;  %s673_s30 = sand.u32 1, %s979_s18  }
 0x203   : > { %s674_s8 = scalar_lea.sflag [#allocation3], %s673_s30 }
 0x204   : > { %p839_p6 = pnand %p842_p5, %p1102_p8 }
 0x206   : > { %974 = dma.done.wait (!%p839_p6), %s674_s8, 2048  }
 0x207   : > { %976 = vsyncadd (!%p839_p6), %s674_s8, 4294965248  ;;  %s18_s25 = sadd.s32 1, %s1007_s25   ;;  %s1304_s18 = smov %s983_s19 }
 0x208   : > { %p15_p7 = scmp.ge.s32.totalorder %s18_s25, 6   ;;  %s1305_s19 = smov %s987_s20 }
 0x209   : > { %s1306_s20 = smov %s1111_s11  ;;  %s1307_s21 = smov %s999_s23 }
 0x20a   : > { %s1308_s22 = smov %s1003_s24  ;;  %s1309_s23 = smov %s1312_s28 }
 0x20b   : > { %s1310_s24 = smov %s1316_s29  ;;  %17 = sbr.rel (!%p15_p7) target bundleno = 5 (0x5), region = 75 }
 0x212   :  { %679 = vsyncpa [#allocation3], 1 }
 0x213   :  { %681 = vsyncpa [#allocation3 + $0x1], 1 }

</bundles_post_ra>
